<compile_context>
chip_gen: v6e
topology: v6e:2x2x1
jax: 0.10.0
libtpu: 0.0.40
codegen_flags: <defaults>
</compile_context>

<pallas_src>
import functools

import jax
import jax.numpy as jnp
from jax.experimental import pallas as pl
from jax.experimental.pallas import tpu as pltpu


def _round_up(x, m):
    return ((x + m - 1) // m) * m


def _cdiv(a, b):
    return -(-a // b)


def _vmem_budget_bytes(frac=0.75):
    """~75% of per-core VMEM: ~48 MiB on v7x, ~96 MiB on v5e/v6e."""
    cap = 64 << 20  # conservative fallback (v7x per-TC VMEM)
    try:
        info = pltpu.get_tpu_info()
        cap_attr = getattr(info, "vmem_capacity_bytes", None)
        if cap_attr:
            cap = int(cap_attr)
    except Exception:
        pass
    return max(int(cap * frac), 16 << 20)


def _choose_tm(M, target=512):
    """Balanced row tiles near `target`, >= 2 tiles when possible (v7x has 2
    TensorCores); multiple of 8 (sublane)."""
    if M <= 8:
        return 8
    n_tiles = max(_cdiv(M, target), 2)
    return _round_up(_cdiv(M, n_tiles), 8)


def _choose_tn(Fp, tm, budget_bytes, w_itemsize, cast_scratch_bytes):
    """Largest weight column tile (multiple of 256 when Fp allows, else 128,
    dividing Fp) whose double-buffered working set fits the VMEM budget."""
    gran = 256 if Fp % 256 == 0 else 128

    def cost(tn):
        c = (2 * tm * Fp * 4                # x row tile, double-buffered
             + 2 * Fp * tn * w_itemsize     # weight tile, double-buffered
             + 2 * tm * tn * 4)             # output tile, double-buffered
        if tn < Fp:
            c += cast_scratch_bytes         # bf16 x cache (only if column-tiled)
        return c

    if cost(Fp) <= budget_bytes:
        return Fp                           # whole W^T resident per row tile
    q = Fp // gran
    for d in range(q, 0, -1):
        if q % d == 0 and cost(gran * d) <= budget_bytes:
            return gran * d
    return gran


def _glu_kernel(x_ref, wt_ref, o_ref, *scratch, tn, n_col_blocks, col_axis,
                matmul_dtype, cache_cast):
    # x_ref:  (TM, Fp) row tile of the flattened input (full feature width)
    # wt_ref: (Fp, TN) column tile of W_eff^T  (z = x @ wt == x @ W_eff^T)
    # o_ref:  (TM, TN)
    if cache_cast:
        # x tile is resident across the column axis; cast to the matmul dtype
        # once (first column step) instead of re-casting every step.
        x_mm_ref = scratch[0]

        @pl.when(pl.program_id(col_axis) == 0)
        def _():
            x_mm_ref[...] = x_ref[...].astype(matmul_dtype)

        x_mm = x_mm_ref[...]
    else:
        x_mm = x_ref[...].astype(matmul_dtype)

    z = jnp.dot(x_mm, wt_ref[...], preferred_element_type=jnp.float32)

    # tanh only needs the output-column slice of x; offset is lane-aligned.
    if n_col_blocks > 1:
        j = pl.program_id(col_axis)
        col0 = pl.multiple_of(j * tn, 128)
        x_cols = x_ref[:, pl.ds(col0, tn)]
    else:
        x_cols = x_ref[...]

    # sigmoid(z) = 0.5 * tanh(0.5 * z) + 0.5 : exact identity, single EUP push
    # per element (vs exp + reciprocal) so EUP stays off the critical path.
    sig = 0.5 * jnp.tanh(0.5 * z) + 0.5
    o_ref[...] = (jnp.tanh(x_cols.astype(jnp.float32)) * sig).astype(o_ref.dtype)


def glu_forward(x, w_eff, *, use_bf16_matmul=True, row_tile_target=512):
    """x: (..., F) float32; w_eff: (F, F) effective weight-norm Linear weight.

    use_bf16_matmul=True feeds the MXU bf16 operands with f32 accumulation
    (perf default; output error ~1e-2 worst case for O(1) activations).
    Set False for exact f32 operands.
    """
    orig_shape = x.shape
    F = orig_shape[-1]
    x2d = x.reshape(-1, F)
    M = x2d.shape[0]

    Fp = max(_round_up(F, 128), 128)            # lane-dense feature dim
    matmul_dtype = jnp.bfloat16 if use_bf16_matmul else x.dtype
    w_itemsize = 2 if use_bf16_matmul else jnp.dtype(x.dtype).itemsize

    budget = _vmem_budget_bytes()
    tm = min(_choose_tm(M, row_tile_target), _round_up(M, 8))
    cast_scratch_bytes = tm * Fp * 2 if use_bf16_matmul else 0

    # Shrink tm if even the narrowest weight tile would overflow the budget.
    gran = 256 if Fp % 256 == 0 else 128
    while tm > 8 and (2 * tm * Fp * 4 + 2 * Fp * gran * w_itemsize
                      + 2 * tm * gran * 4 + cast_scratch_bytes) > budget:
        tm = max(8, _round_up(tm // 2, 8))
        cast_scratch_bytes = tm * Fp * 2 if use_bf16_matmul else 0

    tn = _choose_tn(Fp, tm, budget, w_itemsize, cast_scratch_bytes)

    n_i = _cdiv(M, tm)      # ragged last row tile: no M padding, no row slice
    n_j = Fp // tn

    # Only materialize a padded copy when the feature dim needs lane padding
    # (padded x columns / weight rows+cols are zero -> real outputs exact).
    x_p = x2d if Fp == F else jnp.pad(x2d, ((0, 0), (0, Fp - F)))
    wt = w_eff.T                                # (in, out): z = x @ wt
    wt_p = wt if Fp == F else jnp.pad(wt, ((0, Fp - F), (0, Fp - F)))
    wt_p = wt_p.astype(matmul_dtype)

    # Grid order: keep whichever operand residency minimizes HBM traffic.
    #   row-major (i outer, j inner): x resident, W^T streamed once per row tile
    #   col-major (j outer, i inner): W^T column tile resident, x re-streamed
    x_bytes = M * Fp * jnp.dtype(x.dtype).itemsize
    w_bytes = Fp * Fp * w_itemsize
    row_major = (n_j == 1) or (n_i * w_bytes + x_bytes <= n_j * x_bytes + w_bytes)

    cache_cast = row_major and n_j > 1 and use_bf16_matmul
    scratch_shapes = [pltpu.VMEM((tm, Fp), matmul_dtype)] if cache_cast else []

    if row_major:
        grid = (n_i, n_j)
        col_axis = 1
        in_specs = [pl.BlockSpec((tm, Fp), lambda i, j: (i, 0)),
                    pl.BlockSpec((Fp, tn), lambda i, j: (0, j))]
        out_spec = pl.BlockSpec((tm, tn), lambda i, j: (i, j))
        # The bf16 x cache is carried across the column axis -> keep it serial.
        semantics = ("parallel", "arbitrary") if cache_cast else ("parallel", "parallel")
    else:
        grid = (n_j, n_i)
        col_axis = 0
        in_specs = [pl.BlockSpec((tm, Fp), lambda j, i: (i, 0)),
                    pl.BlockSpec((Fp, tn), lambda j, i: (0, j))]
        out_spec = pl.BlockSpec((tm, tn), lambda j, i: (i, j))
        semantics = ("parallel", "parallel")

    vmem_cost = (2 * tm * Fp * 4 + 2 * Fp * tn * w_itemsize + 2 * tm * tn * 4
                 + (tm * Fp * 2 if cache_cast else 0))
    vmem_limit = min(max(vmem_cost + (4 << 20), 16 << 20), budget)

    cost = pl.CostEstimate(
        flops=2 * M * Fp * Fp,
        transcendentals=2 * M * Fp,             # tanh(x) + tanh(z/2) per element
        bytes_accessed=(2 * x_bytes             # read x + write out
                        + w_bytes * (n_i if (row_major and n_j > 1) else 1)),
    )

    kernel = functools.partial(
        _glu_kernel, tn=tn, n_col_blocks=n_j, col_axis=col_axis,
        matmul_dtype=matmul_dtype, cache_cast=cache_cast)

    out = pl.pallas_call(
        kernel,
        out_shape=jax.ShapeDtypeStruct((M, Fp), x.dtype),
        grid_spec=pltpu.PrefetchScalarGridSpec(
            num_scalar_prefetch=0,
            grid=grid,
            in_specs=in_specs,
            out_specs=out_spec,
            scratch_shapes=scratch_shapes,
        ),
        compiler_params=pltpu.CompilerParams(
            dimension_semantics=semantics,
            vmem_limit_bytes=vmem_limit,
        ),
        cost_estimate=cost,
    )(x_p, wt_p)

    # TODO(synk): single-buffer the resident weight tile with
    # pipeline_mode=pl.Buffered(1) once verified on the deployed jax version;
    # it frees Fp*tn*itemsize of VMEM with nothing to overlap.

    out = out if Fp == F else out[:, :F]
    return out.reshape(orig_shape)


def make_glu_params(feat_size, key):
    """Deterministic synthetic params mimicking weight_norm(nn.Linear(F, F, bias=False)).

    weight_norm stores v (direction) and g (per-output-row magnitude); the
    effective weight is W_eff = g * v / ||v||_row, with g initialized to
    ||v||_row at wrap time.
    """
    v = jax.random.normal(key, (feat_size, feat_size), dtype=jnp.float32)
    row_norm = jnp.sqrt(jnp.sum(v * v, axis=1, keepdims=True))
    g = row_norm
    return g * v / row_norm


if __name__ == "__main__":
    key = jax.random.PRNGKey(0)
    k_x, k_w, k_x2 = jax.random.split(key, 3)

    # Shapes consistent with GLU: Linear over the last (feature) dim.
    batch, seq, feat = 2, 8, 32
    x = jax.random.normal(k_x, (batch, seq, feat), dtype=jnp.float32)
    w_eff = make_glu_params(feat, k_w)
    ref = jnp.tanh(x) * jax.nn.sigmoid(jnp.einsum("btf,gf->btg", x, w_eff))

    # Exact-operand path (f32 MXU), tight tolerance.
    out_f32 = jax.block_until_ready(glu_forward(x, w_eff, use_bf16_matmul=False))
    assert out_f32.shape == x.shape
    assert jnp.allclose(out_f32, ref, atol=2e-3, rtol=2e-3), float(
        jnp.max(jnp.abs(out_f32 - ref)))

    # Default perf path (bf16 operands, f32 accumulation), bf16-level tolerance.
    out_bf16 = jax.block_until_ready(glu_forward(x, w_eff))
    assert jnp.allclose(out_bf16, ref, atol=3e-2, rtol=3e-2), float(
        jnp.max(jnp.abs(out_bf16 - ref)))

    # Odd shape (M=15 rows, F=40 features): exercises the ragged last row tile
    # and the feature-dim lane-padding path.
    x2 = jax.random.normal(k_x2, (3, 5, 40), dtype=jnp.float32)
    w2 = make_glu_params(40, k_w)
    ref2 = jnp.tanh(x2) * jax.nn.sigmoid(jnp.einsum("btf,gf->btg", x2, w2))

    out2_f32 = jax.block_until_ready(glu_forward(x2, w2, use_bf16_matmul=False))
    assert out2_f32.shape == x2.shape
    assert jnp.allclose(out2_f32, ref2, atol=2e-3, rtol=2e-3), float(
        jnp.max(jnp.abs(out2_f32 - ref2)))

    out2 = jax.block_until_ready(glu_forward(x2, w2))
    assert jnp.allclose(out2, ref2, atol=3e-2, rtol=3e-2), float(
        jnp.max(jnp.abs(out2 - ref2)))

    print("KERNEL_OK")
</pallas_src>

<mosaic_0001>
module attributes {stable_mosaic.version = 11 : i64} {
  func.func @_glu_kernel(%arg0: i32, %arg1: i32, %arg2: memref<8x128xf32, #tpu.memory_space<vmem>>, %arg3: memref<128x128xf32, #tpu.memory_space<vmem>>, %arg4: memref<8x128xf32, #tpu.memory_space<vmem>>) attributes {dimension_semantics = [#tpu.dimension_semantics<parallel>, #tpu.dimension_semantics<parallel>], iteration_bounds = array<i64: 2, 1>, scalar_prefetch = 0 : i64, scratch_operands = 0 : i64, tpu.core_type = #tpu.core_type<tc>, window_params = [{transform_indices = @transform_0, window_bounds = array<i64: 8, 128>}, {transform_indices = @transform_1, window_bounds = array<i64: 128, 128>}, {transform_indices = @transform_2, window_bounds = array<i64: 8, 128>}]} {
    %c0 = arith.constant 0 : index
    %c0_0 = arith.constant 0 : index
    %0 = vector.load %arg2[%c0, %c0_0] : memref<8x128xf32, #tpu.memory_space<vmem>>, vector<8x128xf32>
    %c0_1 = arith.constant 0 : index
    %c0_2 = arith.constant 0 : index
    %1 = vector.load %arg3[%c0_1, %c0_2] : memref<128x128xf32, #tpu.memory_space<vmem>>, vector<128x128xf32>
    %cst = arith.constant dense<0.000000e+00> : vector<8x128xf32>
    %2 = tpu.matmul %0, %1, %cst {dimension_numbers = #tpu.dot_dimension_numbers<[1], [0], [0], [1], [0, 0, 1, 1], [], []>} : vector<8x128xf32>, vector<128x128xf32>, vector<8x128xf32> -> vector<8x128xf32>
    %c0_3 = arith.constant 0 : index
    %c0_4 = arith.constant 0 : index
    %3 = vector.load %arg2[%c0_3, %c0_4] : memref<8x128xf32, #tpu.memory_space<vmem>>, vector<8x128xf32>
    %cst_5 = arith.constant 5.000000e-01 : f32
    %4 = vector.broadcast %cst_5 : f32 to vector<8x128xf32>
    %5 = arith.mulf %4, %2 : vector<8x128xf32>
    %6 = math.tanh %5 : vector<8x128xf32>
    %cst_6 = arith.constant 5.000000e-01 : f32
    %7 = vector.broadcast %cst_6 : f32 to vector<8x128xf32>
    %8 = arith.mulf %7, %6 : vector<8x128xf32>
    %cst_7 = arith.constant 5.000000e-01 : f32
    %9 = vector.broadcast %cst_7 : f32 to vector<8x128xf32>
    %10 = arith.addf %8, %9 : vector<8x128xf32>
    %11 = math.tanh %3 : vector<8x128xf32>
    %12 = arith.mulf %11, %10 : vector<8x128xf32>
    %c0_8 = arith.constant 0 : index
    %c0_9 = arith.constant 0 : index
    %13 = vector.load %arg4[%c0_8, %c0_9] : memref<8x128xf32, #tpu.memory_space<vmem>>, vector<8x128xf32>
    tpu.vector_store %arg4[%c0_8, %c0_9], %12 {strides = array<i32>} : memref<8x128xf32, #tpu.memory_space<vmem>>, vector<8x128xf32>,
    return
  }
  func.func @transform_0(%arg0: i32, %arg1: i32) -> (i32, i32) {
    %c0_i32 = arith.constant 0 : i32
    %c0_i32_0 = arith.constant 0 : i32
    return %arg0, %c0_i32 : i32, i32
  }
  func.func @transform_1(%arg0: i32, %arg1: i32) -> (i32, i32) {
    %c0_i32 = arith.constant 0 : i32
    %c0_i32_0 = arith.constant 0 : i32
    return %c0_i32, %arg1 : i32, i32
  }
  func.func @transform_2(%arg0: i32, %arg1: i32) -> (i32, i32) {
    %c0_i32 = arith.constant 0 : i32
    return %arg0, %arg1 : i32, i32
  }
}

</mosaic_0001>

<bundles_post_ra>
// kernel: tpu_custom_call.1
= control target key start
LH: loop header
LB: loop body
LE: loop exit
PB: predicated region body
PF: predicated region fallthrough
CT: control target
= control target key end

     0   :  { %7 = vsyncpa [#allocation3], 0  ;;  %s879_s0 = inlined_call_operand.hbm [shape: f32[16,128], index: 0, kind: input, shape index: {}]   ;;  %s880_s1 = inlined_call_operand.hbm [shape: f32[128,128], index: 1, kind: input, shape index: {}]   ;;  %s881_s2 = inlined_call_operand.hbm [shape: f32[16,128], index: 2, kind: output, shape index: {}]  }
   0x1   :  { %9 = vsyncpa [#allocation3 + $0x1], 0 }
   0x2   :  { %10 = vsyncpa [#allocation6], 0 }
   0x3   :  { %11 = vsyncpa [#allocation4], 0 }
   0x4   :  { %13 = vsyncpa [#allocation4 + $0x1], 0  ;;  %s705_s9 = smov 0   ;;  %s707_s10 = smov 0  }
   0x5   :  { %s709_s11 = smov 0   ;;  %s711_s12 = smov 0  }
   0x6   :  { %s713_s13 = smov 0   ;;  %s715_s14 = smov 0  }
   0x7 LB: > { %s395_s15 = sadd.s32 4294967295, %s681_s14   ;;  %s396_s16 = sadd.s32 4294967294, %s681_s14   ;;  %s681_s14 = sphi %s715_s14, %s19_s14   ;;  %s677_s13 = sphi %s713_s13, %s899_s13   ;;  %s673_s12 = sphi %s711_s12, %s898_s12   ;;  %s669_s11 = sphi %s709_s11, %s897_s11   ;;  %s665_s10 = sphi %s707_s10, %s896_s10   ;;  %s661_s9 = sphi %s705_s9, %s895_s9  }
   0x8   : > { %p51_p0 = scmp.ne.s32.totalorder %s665_s10, %s661_s9  ;;  %p739_p1 = scmp.eq.s32.totalorder %s395_s15, 0 }
   0x9   : > { %p743_p2 = scmp.eq.s32.totalorder %s395_s15, 1  ;;  %p109_p3 = scmp.eq.s32.totalorder %s396_s16, 1 }
   0xa   : > { %p749_p4 = por %p739_p1, %p51_p0  ;;  %p397_p5 = scmp.ge.s32.totalorder %s681_s14, 1 }
   0xb   : > { %p754_p6 = por %p109_p3, %p51_p0  ;;  %p116_p7 = scmp.lt.s32.totalorder %s681_s14, 3 }
   0xc   : > { %s885_s19 = scalar_select %p749_p4, 1, 0 }
   0xd   : > { %s886_s20 = scalar_select %p754_p6, 1, 0 }
   0xe   : > { %p759_p8 = pnand %p397_p5, %p116_p7  ;;  %s683_s22 = smov [#allocation5]  }
   0xf   : > { %s130_s23 = sshll.u32 %s683_s22, 4  ;;  %s31_s25 = sadd.s32 1, %s677_s13  ;;  %s131_s23 = int_to_ptr.vmem [resolvable:$true] %s130_s23 }
  0x10   : > { %p470_p9 = pneg %p759_p8  ;;  %s554_s26 = scalar_lea.vmem %s131_s23, 2048 }
  0x11   : > { %p555_p13 = scmp.ne.s32.totalorder %s131_s23, %s554_s26  ;;  %p562_p5 = scmp.lt.s32.totalorder %s131_s23, %s131_s23 }
  0x12   : > { %p768_p11 = pnand %p470_p9, %p739_p1  ;;  %p563_p7 = scmp.lt.s32.totalorder %s554_s26, %s554_s26 }
  0x14   : > { %p545_p12 = pneg %p768_p11  ;;  %p564_p6 = por %p563_p7, %p562_p5 }
  0x16   : > { %p557_p0 = pnand %p555_p13, %p545_p12 }
  0x18   : > { %p558_p3 = pneg %p557_p0 }
  0x1a   : > { %p565_p4 = pnand %p564_p6, %p558_p3 }
  0x1c   : > { %568 = shalt.err (!%p565_p4)
}
  0x1d   : > { %s684_s27 = smov 128   ;;  %s685_s28 = smov 8  }
  0x1e   : > { %473 = dma.hbm_to_vmem [thread:$0]  (!%p768_p11), %s880_s1, 2048, %s131_s23, [#allocation6], %s684_s27, %s684_s27, %s685_s28  }
  0x1f   : > { %p33_p6 = scmp.ge.s32.totalorder %s31_s25, 2  ;;  %s38_s3 = sadd.s32 1, %s669_s11 }
  0x20   : > { %p45_p4 = scmp.ne.s32.totalorder %s669_s11, %s665_s10  ;;  %p46_p9 = scmp.eq.s32.totalorder %s681_s14, 0 }
  0x21   : > { %s901_s25 = smov (%p33_p6, %s31_s25), 0  ;;  %p483_p0 = scmp.lt.s32.totalorder %s681_s14, 2 }
  0x22   : > { %p786_p12 = por %p46_p9, %p45_p4  ;;  %p792_p13 = por %p743_p2, %p45_p4 }
  0x23   : > { %s35_s6 = ssub.s32 %s677_s13, %s901_s25  ;;  %s144_s7 = sand.u32 1, %s669_s11  }
  0x24   : > { %p36_p11 = scmp.eq.s32.totalorder %s35_s6, 0  ;;  %s400_s8 = sshll.u32 %s144_s7, 3 }
  0x25   : > { %s401_s16 = sshll.u32 %s677_s13, 7  ;;  %s148_s26 = scalar_lea.vmem [#allocation2], %s400_s8 }
  0x26   : > { %s801_s15 = scalar_select %p36_p11, %s669_s11, %s38_s3  }
  0x27   : > { %s153_s24 = scalar_lea.hbm %s879_s0, %s401_s16  ;;  %s155_s27 = sshll.u32 %s148_s26, 4  ;;  %s156_s27 = int_to_ptr.vmem [resolvable:$true] %s155_s27 }
  0x28   : > { %p809_p2 = pnand %p483_p0, %p786_p12  ;;  %s145_s28 = scalar_lea.sflag [#allocation3], %s144_s7 }
  0x29   : > { %s582_s29 = scalar_lea.vmem %s156_s27, 128  ;;  %s686_s30 = smov [#allocation2]  }
  0x2a   : > { %p571_p3 = pneg %p809_p2  ;;  %p583_p5 = scmp.ne.s32.totalorder %s156_s27, %s582_s29 }
  0x2b   : > { %s587_s3 = sshll.u32 %s686_s30, 4  ;;  %s588_s3 = int_to_ptr.vmem [resolvable:$false] %s587_s3 }
  0x2c   : > { %p585_p7 = pnand %p583_p5, %p571_p3  ;;  %s589_s6 = scalar_lea.vmem %s588_s3, 256 }
  0x2d   : > { %p590_p4 = scmp.lt.s32.totalorder %s156_s27, %s588_s3  ;;  %p591_p9 = scmp.lt.s32.totalorder %s589_s6, %s582_s29 }
  0x2e   : > { %p586_p6 = pneg %p585_p7 }
  0x2f   : > { %p592_p11 = por %p591_p9, %p590_p4 }
  0x31   : > { %p593_p10 = pnand %p592_p11, %p586_p6 }
  0x33   : > { %596 = shalt.err (!%p593_p10)
}
  0x34   : > { %477 = dma.hbm_to_vmem [thread:$0]  (!%p809_p2), %s153_s24, 128, %s156_s27, %s145_s28  }
  0x35   : > { %164 = sbr.rel (%p759_p8) target bundleno = 322 (0x142), region = 28  ;;  %s820_s4 = sand.u32 (!%p759_p8), 1, %s665_s10  }
  0x36   : > { %s403_s7 = sshll.u32 (!%p759_p8), %s820_s4, 3  ;;  %s167_s8 = scalar_lea.sflag (!%p759_p8), [#allocation3], %s820_s4 }
  0x37   : > { %s826_s16 = scalar_lea.vmem (!%p759_p8), [#allocation2], %s403_s7  ;;  %p892_p12 = scmp.ne.s32.totalorder (!%p759_p8), %s885_s19, 0 }
  0x3a   : > { %648 = dma.done.wait (%p892_p12), %s167_s8, 128  }
  0x3b   : > { %650 = vsyncadd (%p892_p12), %s167_s8, 4294967168 }
  0x3c   : > { %652 = dma.done.wait (%p739_p1), [#allocation6], 2048  }
  0x3d   : > { %654 = vsyncadd (%p739_p1), [#allocation6], 4294965248  ;;  %v687_v0 = vmov 0.0   ;;  %vm688_vm0 = vmmov 0   ;;  %v211_v1 = vld [vmem:[#allocation5 + $0x78] sm:$0xff]  ;;  %v210_v2 = vld [vmem:[#allocation5 + $0x70] sm:$0xff] }
  0x3e   : > { %427 = vmatprep.subr.mxu0 %v687_v0  ;;  %459 = vmatprep.mubr.msk.f32.mxu0 %vm688_vm0, %v687_v0  ;;  %v209_v3 = vld [vmem:[#allocation5 + $0x68] sm:$0xff]  ;;  %v208_v4 = vld [vmem:[#allocation5 + $0x60] sm:$0xff]  ;;  %v207_v5 = vld [vmem:[#allocation5 + $0x58] sm:$0xff]  ;;  %s407_s17 = sshll.u32 %s673_s12, 7  ;;  %s194_s19 = scalar_lea.vmem [#allocation7], %s403_s7 }
  0x3f   : > { %428 = vmatpush3.msra.mxu0 %v211_v1  ;;  %v206_v6 = vld [vmem:[#allocation5 + $0x50] sm:$0xff]  ;;  %v205_v7 = vld [vmem:[#allocation5 + $0x48] sm:$0xff]  ;;  %v204_v8 = vld [vmem:[#allocation5 + $0x40] sm:$0xff]  ;;  %s304_s21 = sshll.u32 %s194_s19, 4  ;;  %s302_s24 = scalar_lea.hbm %s881_s2, %s407_s17  ;;  %s305_s21 = int_to_ptr.vmem [resolvable:$true] %s304_s21 }
  0x40   : > { %429 = vmatprep.subr.mxu0 %v687_v0  ;;  %v203_v9 = vld [vmem:[#allocation5 + $0x38] sm:$0xff]  ;;  %v202_v10 = vld [vmem:[#allocation5 + $0x30] sm:$0xff]  ;;  %v201_v11 = vld [vmem:[#allocation5 + $0x28] sm:$0xff]  ;;  %s290_s26 = scalar_lea.sflag [#allocation4], %s820_s4  ;;  %s597_s27 = scalar_lea.vmem %s305_s21, 128 }
  0x41   : > { %430 = vmatpush3.msra.mxu0 %v210_v2  ;;  %v200_v12 = vld [vmem:[#allocation5 + $0x20] sm:$0xff]  ;;  %v199_v13 = vld [vmem:[#allocation5 + $0x18] sm:$0xff]  ;;  %v198_v14 = vld [vmem:[#allocation5 + $0x10] sm:$0xff]  ;;  %p598_p1 = scmp.ne.s32.totalorder %s305_s21, %s597_s27  ;;  %s689_s18 = smov [#allocation7]  }
  0x42   : > { %431 = vmatprep.subr.mxu0 %v687_v0  ;;  %v197_v15 = vld [vmem:[#allocation5 + $0x8] sm:$0xff]  ;;  %v196_v16 = vld [vmem:[#allocation5] sm:$0xff]  ;;  %v195_v17 = vld [vmem:[%s826_s16] sm:$0xff]  ;;  %s601_s28 = sshll.u32 %s689_s18, 4  ;;  %s602_s28 = int_to_ptr.vmem [resolvable:$false] %s601_s28 }
  0x43   : > { %432 = vmatpush3.msra.mxu0 %v209_v3  ;;  %p599_p8 = pnand %p598_p1, %p792_p13  ;;  %s603_s12 = scalar_lea.vmem %s602_s28, 256 }
  0x44   : > { %433 = vmatprep.subr.mxu0 %v687_v0  ;;  %p604_p0 = scmp.lt.s32.totalorder %s305_s21, %s602_s28  ;;  %p605_p2 = scmp.lt.s32.totalorder %s603_s12, %s597_s27 }
  0x45   : > { %434 = vmatpush3.msra.mxu0 %v208_v4  ;;  %p600_p10 = pneg %p599_p8 }
  0x46   : > { %435 = vmatprep.subr.mxu0 %v687_v0  ;;  %p606_p3 = por %p605_p2, %p604_p0 }
  0x47   : > { %436 = vmatpush3.msra.mxu0 %v207_v5 }
  0x48   : > { %437 = vmatprep.subr.mxu0 %v687_v0  ;;  %p607_p5 = pnand %p606_p3, %p600_p10 }
  0x49   : > { %438 = vmatpush3.msra.mxu0 %v206_v6 }
  0x4a   : > { %439 = vmatprep.subr.mxu0 %v687_v0 }
  0x4b   : > { %440 = vmatpush3.msra.mxu0 %v205_v7 }
  0x4c   : > { %441 = vmatprep.subr.mxu0 %v687_v0 }
  0x4d   : > { %442 = vmatpush3.msra.mxu0 %v204_v8 }
  0x4e   : > { %443 = vmatprep.subr.mxu0 %v687_v0 }
  0x4f   : > { %444 = vmatpush3.msra.mxu0 %v203_v9 }
  0x50   : > { %445 = vmatprep.subr.mxu0 %v687_v0 }
  0x51   : > { %446 = vmatpush3.msra.mxu0 %v202_v10 }
  0x52   : > { %447 = vmatprep.subr.mxu0 %v687_v0 }
  0x53   : > { %448 = vmatpush3.msra.mxu0 %v201_v11 }
  0x54   : > { %449 = vmatprep.subr.mxu0 %v687_v0 }
  0x55   : > { %450 = vmatpush3.msra.mxu0 %v200_v12 }
  0x56   : > { %451 = vmatprep.subr.mxu0 %v687_v0 }
  0x57   : > { %452 = vmatpush3.msra.mxu0 %v199_v13 }
  0x58   : > { %453 = vmatprep.subr.mxu0 %v687_v0 }
  0x59   : > { %454 = vmatpush3.msra.mxu0 %v198_v14 }
  0x5a   : > { %455 = vmatprep.subr.mxu0 %v687_v0 }
  0x5b   : > { %456 = vmatpush3.msra.mxu0 %v197_v15 }
  0x5c   : > { %457 = vmatprep.subr.mxu0 %v687_v0 }
  0x5d   : > { %458 = vmatpush3.msra.mxu0 %v196_v16 }
  0x5e   : > { %460 = vmatmul.mubr.f32.vlgmr.msra.gmra.mxu0 %v195_v17 }
 0x11e   : > { %v278_v18 = vpop.f32.mrf.mxu0 }
 0x11f   : > { %v282_v19 = vmul.f32 0.5, %v278_v18 }
 0x120   : > { %v461_v20 = vpop.f32.mrf.mxu0 }
 0x121   : > { %539 = vtanh.f32 %v282_v19 }
 0x122   : > { %541 = vtanh.f32 %v195_v17 }
 0x12e   : > { %v540_v21 = vpop.eup %539 }
 0x12f   : > { %v284_v22 = vmul.f32 0.5, %v540_v21  ;;  %v542_v23 = vpop.eup %541 }
 0x131   : > { %v285_v24 = vadd.f32 0.5, %v284_v22 }
 0x133   : > { %v287_v25 = vmul.f32 %v542_v23, %v285_v24 }
 0x135   : > { %288 = vst [vmem:[%s194_s19] sm:$0xff] %v287_v25 }
 0x136   : > { %610 = shalt.err (!%p607_p5)
}
 0x137   : > { %s611_s29 = scalar_lea.hbm %s302_s24, 128  ;;  %s615_s6 = scalar_lea.hbm %s881_s2, 256 }
 0x138   : > { %p612_p7 = scmp.ne.s32.totalorder %s302_s24, %s611_s29  ;;  %p616_p9 = scmp.lt.s32.totalorder %s302_s24, %s881_s2 }
 0x139   : > { %p617_p11 = scmp.lt.s32.totalorder %s615_s6, %s611_s29 }
 0x13a   : > { %p613_p6 = pnand %p612_p7, %p792_p13 }
 0x13b   : > { %p618_p12 = por %p617_p11, %p616_p9 }
 0x13c   : > { %p614_p4 = pneg %p613_p6 }
 0x13e   : > { %p619_p1 = pnand %p618_p12, %p614_p4 }
 0x140   : > { %622 = shalt.err (!%p619_p1)
}
 0x141   : > { %468 = dma.vmem_to_hbm [thread:$0]  (%p792_p13), %s305_s21, 128, %s302_s24, %s290_s26  }
 0x142 PF: > { %s316_s8 = sand.u32 1, %s661_s9   ;;  %p893_p8 = scmp.ne.s32.totalorder %s886_s20, 0 }
 0x143   : > { %p894_p10 = scmp.ge.s32.totalorder %s681_s14, 2  ;;  %s317_s16 = scalar_lea.sflag [#allocation4], %s316_s8 }
 0x145   : > { %p479_p0 = pnand %p894_p10, %p893_p8 }
 0x147   : > { %p480_p2 = pneg %p479_p0 }
 0x149   : > { %656 = dma.done.wait (%p480_p2), %s317_s16, 128  }
 0x14a   : > { %658 = vsyncadd (%p480_p2), %s317_s16, 4294967168  ;;  %s19_s14 = sadd.s32 1, %s681_s14   ;;  %s895_s9 = smov %s665_s10 }
 0x14b   : > { %p16_p3 = scmp.ge.s32.totalorder %s19_s14, 4   ;;  %s896_s10 = smov %s669_s11 }
 0x14c   : > { %s897_s11 = smov %s801_s15  ;;  %s898_s12 = smov %s677_s13 }
 0x14d   : > { %s899_s13 = smov %s901_s25  ;;  %18 = sbr.rel (!%p16_p3) target bundleno = 7 (0x7), region = 78 }
 0x152   :  { %322 = vsyncpa [#allocation3], 1 }
 0x153   :  { %324 = vsyncpa [#allocation3 + $0x1], 1 }
 0x154   :  { %325 = vsyncpa [#allocation6], 1 }
 0x155   :  { %326 = vsyncpa [#allocation4], 1 }
 0x156   :  { %328 = vsyncpa [#allocation4 + $0x1], 1 }

</bundles_post_ra>
